<compile_context>
chip_gen: v7x
topology: tpu7x:2x2x1
jax: 0.10.0
libtpu: 0.0.40
codegen_flags: <defaults>
</compile_context>

<pallas_src>
import functools

import jax
import jax.numpy as jnp
from jax import lax
from jax.experimental import pallas as pl
from jax.experimental.pallas import tpu as pltpu


def _triplet_colmajor_kernel(xr_ref, xc_ref, sqr_ref, sqc_ref, tr_ref, tc_ref,
                             hinge_ref, *, margin):
    f32 = jnp.float32

    # gram_t[j, i] = -2 * <x_j, x_i>  (the -2 is folded into the row operand
    # in the wrapper).  Contraction on the LAST dim of BOTH operands: the big
    # resident (N, D) operand streams through the MXU un-transposed; only the
    # small (TQ, D) weight tile is reoriented.
    gram_t = lax.dot_general(xc_ref[...], xr_ref[...],
                             (((1,), (1,)), ((), ())),
                             preferred_element_type=f32)          # (N, TQ)

    # Shifted squared distance: m[j, i] = ||x_j||^2 - 2<x_j, x_i>.  The per-i
    # constant ||x_i||^2 does not change the arg-max/min over j, and clamp /
    # sqrt are monotone, so mining on m is equivalent to mining on dist.
    m = sqc_ref[...] + gram_t                                      # (N, TQ)

    same = tc_ref[...] == tr_ref[...]                              # (N, TQ) bool
    big = f32(1e30)
    sel = jnp.where(same, big, -big)   # one mask-derived tile reused for both selects
    # Hard positive: max over same-label rows (min(m, sel) kills the rest).
    # Hard negative: min over other-label rows (max(m, sel) kills same-label).
    ap = jnp.max(jnp.minimum(m, sel), axis=0, keepdims=True)       # (1, TQ)
    an = jnp.min(jnp.maximum(m, sel), axis=0, keepdims=True)       # (1, TQ)

    # Only 2*TQ clamps + sqrts (EUP), instead of TQ*N.
    sq_row = sqr_ref[...]                                          # (1, TQ)
    dist_ap = jnp.sqrt(jnp.maximum(sq_row + ap, f32(1e-12)))
    dist_an = jnp.sqrt(jnp.maximum(sq_row + an, f32(1e-12)))

    # MarginRankingLoss(dist_an, dist_ap, y=1) per row; lane-dense store.
    hinge_ref[...] = jnp.maximum(dist_ap - dist_an + f32(margin), 0.0)


def _round_up(v, m):
    return (v + m - 1) // m * m


def _default_block_rows():
    try:
        kind = jax.devices()[0].device_kind.lower()
    except Exception:
        return 128
    # 256 matches the 256-wide MXU output tile on v6e/v7x; v5e and older are 128-wide.
    if any(tag in kind for tag in ("v2", "v3", "v4", "v5")):
        return 128
    return 256


def _vmem_limit_bytes():
    try:
        cap = pltpu.get_tpu_info().vmem_capacity_bytes
    except Exception:
        cap = 128 * 1024 * 1024
    return int(0.7 * cap)


def triplet_loss_pallas(inputs, targets, margin=0.3, *, block_rows=None,
                        matmul_dtype=None):
    """inputs: (N, D) features; targets: (N,) integer labels -> scalar loss.

    block_rows is rounded up to a multiple of 128 (lane-dense blocks).
    matmul_dtype=jnp.bfloat16 feeds the MXU bf16 operands (cast wrapper-side;
    norms / mining math stay f32).  Default f32 tracks the PyTorch reference
    exactly (bf16 cancellation can flip the hard-mined pair discretely).
    """
    n, d = inputs.shape
    x = inputs.astype(jnp.float32)
    t = targets.astype(jnp.int32)

    if matmul_dtype is None:
        matmul_dtype = jnp.float32
    if block_rows is None:
        block_rows = _default_block_rows()

    tq = max(128, _round_up(block_rows, 128))
    n_pad = _round_up(n, tq)
    pad = n_pad - n

    # Hoisted precompute (done once, not per grid step).
    sq = jnp.sum(x * x, axis=1)                    # (N,) f32 squared norms
    xr = (-2.0) * x                                # fold -2 into the small operand
    if pad:
        xr = jnp.pad(xr, ((0, pad), (0, 0)))
        sq_row = jnp.pad(sq, (0, pad)).reshape(1, n_pad)
        # Padded query rows get label -1; they are sliced off before the mean,
        # and padding exists only on the query side, so a real negative label
        # can never alias into the candidate set.
        t_row = jnp.pad(t, (0, pad), constant_values=-1).reshape(1, n_pad)
    else:
        sq_row = sq.reshape(1, n)
        t_row = t.reshape(1, n)

    xr = xr.astype(matmul_dtype)                   # (n_pad, D) row blocks (M-weights side)
    xc = x.astype(matmul_dtype)                    # (N, D) resident candidates
    sq_col = sq.reshape(n, 1)                      # (N, 1) f32
    t_col = t.reshape(n, 1)                        # (N, 1) int32

    kernel = functools.partial(_triplet_colmajor_kernel, margin=margin)
    grid = (n_pad // tq,)

    def _call(single_buffer_resident):
        # Grid-invariant operands: constant index_map; single-buffer them so the
        # resident (N, D) block is not duplicated in VMEM.
        res = {"pipeline_mode": pl.Buffered(1)} if single_buffer_resident else {}
        return pl.pallas_call(
            kernel,
            out_shape=jax.ShapeDtypeStruct((1, n_pad), jnp.float32),
            grid=grid,
            in_specs=[
                pl.BlockSpec((tq, d), lambda i: (i, 0)),           # -2 * x, row block
                pl.BlockSpec((n, d), lambda i: (0, 0), **res),     # all features (resident)
                pl.BlockSpec((1, tq), lambda i: (0, i)),           # row ||x||^2, lane-major
                pl.BlockSpec((n, 1), lambda i: (0, 0), **res),     # col ||x||^2 (resident)
                pl.BlockSpec((1, tq), lambda i: (0, i)),           # row labels, lane-major
                pl.BlockSpec((n, 1), lambda i: (0, 0), **res),     # col labels (resident)
            ],
            out_specs=pl.BlockSpec((1, tq), lambda i: (0, i)),     # lane-dense hinge
            compiler_params=pltpu.CompilerParams(
                dimension_semantics=("parallel",),
                vmem_limit_bytes=_vmem_limit_bytes(),
            ),
        )(xr, xc, sq_row, sq_col, t_row, t_col)

    try:
        hinge = _call(True)
    except Exception:
        # Fallback in case single-buffering (Buffered(1)) is rejected.
        hinge = _call(False)

    # Mean over the real rows (padded query rows dropped); tiny wrapper-side
    # reduce so the grid axis stays "parallel".
    return jnp.mean(hinge[0, :n])


def _triplet_loss_ref(inputs, targets, margin=0.3):
    """Pure-JAX reference mirroring the PyTorch module exactly."""
    x = inputs.astype(jnp.float32)
    sq = jnp.sum(x * x, axis=1, keepdims=True)
    gram = jnp.matmul(x, x.T, precision=jax.lax.Precision.HIGHEST)
    d2 = sq + sq.T - 2.0 * gram
    dist = jnp.sqrt(jnp.maximum(d2, 1e-12))
    same = targets[:, None] == targets[None, :]
    big = jnp.float32(1e30)
    dist_ap = jnp.max(jnp.where(same, dist, -big), axis=1)
    dist_an = jnp.min(jnp.where(same, big, dist), axis=1)
    return jnp.mean(jnp.maximum(dist_ap - dist_an + margin, 0.0))


if __name__ == "__main__":
    key = jax.random.PRNGKey(0)
    k1, k2 = jax.random.split(key)

    # Case 1: 8 embeddings, 128-dim features, 4 identities x 2 samples.
    feats = jax.random.normal(k1, (8, 128), dtype=jnp.float32)
    labels = jnp.array([0, 0, 1, 1, 2, 2, 3, 3], dtype=jnp.int32)
    loss = jax.block_until_ready(triplet_loss_pallas(feats, labels, margin=0.3))
    ref = _triplet_loss_ref(feats, labels, margin=0.3)
    assert jnp.allclose(loss, ref, rtol=2e-3, atol=2e-3), (loss, ref)

    # Case 2: multi-step row-tiled grid + row padding
    # (300 rows, 128-row blocks -> grid of 3 with 84 padded query rows).
    feats2 = jax.random.normal(k2, (300, 64), dtype=jnp.float32)
    labels2 = jnp.arange(300, dtype=jnp.int32) % 8   # 8 identities
    loss2 = jax.block_until_ready(
        triplet_loss_pallas(feats2, labels2, margin=0.3, block_rows=128))
    ref2 = _triplet_loss_ref(feats2, labels2, margin=0.3)
    assert jnp.allclose(loss2, ref2, rtol=2e-3, atol=2e-3), (loss2, ref2)

    # Case 3: bf16 MXU-operand path (wrapper-side cast; mining math stays f32).
    loss_bf16 = jax.block_until_ready(
        triplet_loss_pallas(feats2, labels2, margin=0.3, block_rows=128,
                            matmul_dtype=jnp.bfloat16))
    assert bool(jnp.isfinite(loss_bf16)) and abs(float(loss_bf16) - float(ref2)) < 0.1, (
        loss_bf16, ref2)

    print("KERNEL_OK")
</pallas_src>

<mosaic_0001>
module attributes {stable_mosaic.version = 11 : i64} {
  func.func @_triplet_colmajor_kernel(%arg0: i32, %arg1: memref<256x128xf32, #tpu.memory_space<vmem>>, %arg2: memref<8x128xf32, #tpu.memory_space<vmem>>, %arg3: memref<1x256xf32, #tpu.memory_space<vmem>>, %arg4: memref<8x1xf32, #tpu.memory_space<vmem>>, %arg5: memref<1x256xi32, #tpu.memory_space<vmem>>, %arg6: memref<8x1xi32, #tpu.memory_space<vmem>>, %arg7: memref<1x256xf32, #tpu.memory_space<vmem>>) attributes {dimension_semantics = [#tpu.dimension_semantics<parallel>], iteration_bounds = array<i64: 1>, scalar_prefetch = 0 : i64, scratch_operands = 0 : i64, tpu.core_type = #tpu.core_type<tc>, window_params = [{transform_indices = @transform_0, window_bounds = array<i64: 256, 128>}, {pipeline_mode = #tpu.pipeline_mode<synchronous>, transform_indices = @transform_1, window_bounds = array<i64: 8, 128>}, {transform_indices = @transform_2, window_bounds = array<i64: 1, 256>}, {pipeline_mode = #tpu.pipeline_mode<synchronous>, transform_indices = @transform_3, window_bounds = array<i64: 8, 1>}, {transform_indices = @transform_4, window_bounds = array<i64: 1, 256>}, {pipeline_mode = #tpu.pipeline_mode<synchronous>, transform_indices = @transform_5, window_bounds = array<i64: 8, 1>}, {transform_indices = @transform_6, window_bounds = array<i64: 1, 256>}]} {
    %c0 = arith.constant 0 : index
    %c0_0 = arith.constant 0 : index
    %0 = vector.load %arg2[%c0, %c0_0] : memref<8x128xf32, #tpu.memory_space<vmem>>, vector<8x128xf32>
    %c0_1 = arith.constant 0 : index
    %c0_2 = arith.constant 0 : index
    %1 = vector.load %arg1[%c0_1, %c0_2] : memref<256x128xf32, #tpu.memory_space<vmem>>, vector<256x128xf32>
    %cst = arith.constant dense<0.000000e+00> : vector<8x256xf32>
    %2 = tpu.matmul %0, %1, %cst {dimension_numbers = #tpu.dot_dimension_numbers<[1], [1], [0], [0], [0, 0, 1, 0], [], []>} : vector<8x128xf32>, vector<256x128xf32>, vector<8x256xf32> -> vector<8x256xf32>
    %c0_3 = arith.constant 0 : index
    %c0_4 = arith.constant 0 : index
    %3 = vector.load %arg4[%c0_3, %c0_4] : memref<8x1xf32, #tpu.memory_space<vmem>>, vector<8x1xf32>
    %4 = vector.broadcast %3 : vector<8x1xf32> to vector<8x256xf32>
    %5 = arith.addf %4, %2 : vector<8x256xf32>
    %c0_5 = arith.constant 0 : index
    %c0_6 = arith.constant 0 : index
    %6 = vector.load %arg6[%c0_5, %c0_6] : memref<8x1xi32, #tpu.memory_space<vmem>>, vector<8x1xi32>
    %c0_7 = arith.constant 0 : index
    %c0_8 = arith.constant 0 : index
    %7 = vector.load %arg5[%c0_7, %c0_8] : memref<1x256xi32, #tpu.memory_space<vmem>>, vector<1x256xi32>
    %8 = vector.broadcast %6 : vector<8x1xi32> to vector<8x256xi32>
    %9 = vector.broadcast %7 : vector<1x256xi32> to vector<8x256xi32>
    %10 = arith.cmpi eq, %8, %9 : vector<8x256xi32>
    %cst_9 = arith.constant 0.000000e+00 : f32
    %cst_10 = arith.constant 1.000000e+30 : f32
    %11 = arith.subf %cst_9, %cst_10 : f32
    %cst_11 = arith.constant 1.000000e+30 : f32
    %12 = vector.broadcast %cst_11 : f32 to vector<8x256xf32>
    %13 = vector.broadcast %11 : f32 to vector<8x256xf32>
    %14 = arith.select %10, %12, %13 : vector<8x256xi1>, vector<8x256xf32>
    %15 = arith.minimumf %5, %14 : vector<8x256xf32>
    %cst_12 = arith.constant dense<0xFF800000> : vector<256xf32>
    %16 = vector.multi_reduction <maximumf>, %15, %cst_12 [0] : vector<8x256xf32> to vector<256xf32>
    %17 = vector.shape_cast %16 : vector<256xf32> to vector<1x256xf32>
    %18 = arith.maximumf %5, %14 : vector<8x256xf32>
    %cst_13 = arith.constant dense<0x7F800000> : vector<256xf32>
    %19 = vector.multi_reduction <minimumf>, %18, %cst_13 [0] : vector<8x256xf32> to vector<256xf32>
    %20 = vector.shape_cast %19 : vector<256xf32> to vector<1x256xf32>
    %c0_14 = arith.constant 0 : index
    %c0_15 = arith.constant 0 : index
    %21 = vector.load %arg3[%c0_14, %c0_15] : memref<1x256xf32, #tpu.memory_space<vmem>>, vector<1x256xf32>
    %22 = arith.addf %21, %17 : vector<1x256xf32>
    %cst_16 = arith.constant 9.99999996E-13 : f32
    %23 = vector.broadcast %cst_16 : f32 to vector<1x256xf32>
    %24 = arith.maximumf %22, %23 : vector<1x256xf32>
    %25 = math.sqrt %24 : vector<1x256xf32>
    %26 = arith.addf %21, %20 : vector<1x256xf32>
    %cst_17 = arith.constant 9.99999996E-13 : f32
    %27 = vector.broadcast %cst_17 : f32 to vector<1x256xf32>
    %28 = arith.maximumf %26, %27 : vector<1x256xf32>
    %29 = math.sqrt %28 : vector<1x256xf32>
    %30 = arith.subf %25, %29 : vector<1x256xf32>
    %cst_18 = arith.constant 3.000000e-01 : f32
    %31 = vector.broadcast %cst_18 : f32 to vector<1x256xf32>
    %32 = arith.addf %30, %31 : vector<1x256xf32>
    %cst_19 = arith.constant 0.000000e+00 : f32
    %33 = vector.broadcast %cst_19 : f32 to vector<1x256xf32>
    %34 = arith.maximumf %32, %33 : vector<1x256xf32>
    %c0_20 = arith.constant 0 : index
    %c0_21 = arith.constant 0 : index
    %35 = vector.load %arg7[%c0_20, %c0_21] : memref<1x256xf32, #tpu.memory_space<vmem>>, vector<1x256xf32>
    tpu.vector_store %arg7[%c0_20, %c0_21], %34 {strides = array<i32>} : memref<1x256xf32, #tpu.memory_space<vmem>>, vector<1x256xf32>,
    return
  }
  func.func @transform_0(%arg0: i32) -> (i32, i32) {
    %c0_i32 = arith.constant 0 : i32
    %c0_i32_0 = arith.constant 0 : i32
    return %arg0, %c0_i32 : i32, i32
  }
  func.func @transform_1(%arg0: i32) -> (i32, i32) {
    %c0_i32 = arith.constant 0 : i32
    %c0_i32_0 = arith.constant 0 : i32
    %c0_i32_1 = arith.constant 0 : i32
    return %c0_i32, %c0_i32_0 : i32, i32
  }
  func.func @transform_2(%arg0: i32) -> (i32, i32) {
    %c0_i32 = arith.constant 0 : i32
    %c0_i32_0 = arith.constant 0 : i32
    return %c0_i32, %arg0 : i32, i32
  }
  func.func @transform_3(%arg0: i32) -> (i32, i32) {
    %c0_i32 = arith.constant 0 : i32
    %c0_i32_0 = arith.constant 0 : i32
    %c0_i32_1 = arith.constant 0 : i32
    return %c0_i32, %c0_i32_0 : i32, i32
  }
  func.func @transform_4(%arg0: i32) -> (i32, i32) {
    %c0_i32 = arith.constant 0 : i32
    %c0_i32_0 = arith.constant 0 : i32
    return %c0_i32, %arg0 : i32, i32
  }
  func.func @transform_5(%arg0: i32) -> (i32, i32) {
    %c0_i32 = arith.constant 0 : i32
    %c0_i32_0 = arith.constant 0 : i32
    %c0_i32_1 = arith.constant 0 : i32
    return %c0_i32, %c0_i32_0 : i32, i32
  }
  func.func @transform_6(%arg0: i32) -> (i32, i32) {
    %c0_i32 = arith.constant 0 : i32
    %c0_i32_0 = arith.constant 0 : i32
    return %c0_i32, %arg0 : i32, i32
  }
}

module attributes {stable_mosaic.version = 11 : i64} {
  func.func @_triplet_colmajor_kernel(%arg0: i32, %arg1: memref<256x128xf32, #tpu.memory_space<vmem>>, %arg2: memref<8x128xf32, #tpu.memory_space<vmem>>, %arg3: memref<1x256xf32, #tpu.memory_space<vmem>>, %arg4: memref<8x1xf32, #tpu.memory_space<vmem>>, %arg5: memref<1x256xi32, #tpu.memory_space<vmem>>, %arg6: memref<8x1xi32, #tpu.memory_space<vmem>>, %arg7: memref<1x256xf32, #tpu.memory_space<vmem>>) attributes {dimension_semantics = [#tpu.dimension_semantics<parallel>], iteration_bounds = array<i64: 1>, scalar_prefetch = 0 : i64, scratch_operands = 0 : i64, tpu.core_type = #tpu.core_type<tc>, window_params = [{transform_indices = @transform_0, window_bounds = array<i64: 256, 128>}, {pipeline_mode = #tpu.pipeline_mode<synchronous>, transform_indices = @transform_1, window_bounds = array<i64: 8, 128>}, {transform_indices = @transform_2, window_bounds = array<i64: 1, 256>}, {pipeline_mode = #tpu.pipeline_mode<synchronous>, transform_indices = @transform_3, window_bounds = array<i64: 8, 1>}, {transform_indices = @transform_4, window_bounds = array<i64: 1, 256>}, {pipeline_mode = #tpu.pipeline_mode<synchronous>, transform_indices = @transform_5, window_bounds = array<i64: 8, 1>}, {transform_indices = @transform_6, window_bounds = array<i64: 1, 256>}]} {
    %c0 = arith.constant 0 : index
    %c0_0 = arith.constant 0 : index
    %0 = vector.load %arg2[%c0, %c0_0] : memref<8x128xf32, #tpu.memory_space<vmem>>, vector<8x128xf32>
    %c0_1 = arith.constant 0 : index
    %c0_2 = arith.constant 0 : index
    %1 = vector.load %arg1[%c0_1, %c0_2] : memref<256x128xf32, #tpu.memory_space<vmem>>, vector<256x128xf32>
    %cst = arith.constant dense<0.000000e+00> : vector<8x256xf32>
    %2 = tpu.matmul %0, %1, %cst {dimension_numbers = #tpu.dot_dimension_numbers<[1], [1], [0], [0], [0, 0, 1, 0], [], []>} : vector<8x128xf32>, vector<256x128xf32>, vector<8x256xf32> -> vector<8x256xf32>
    %c0_3 = arith.constant 0 : index
    %c0_4 = arith.constant 0 : index
    %3 = vector.load %arg4[%c0_3, %c0_4] : memref<8x1xf32, #tpu.memory_space<vmem>>, vector<8x1xf32>
    %4 = vector.broadcast %3 : vector<8x1xf32> to vector<8x256xf32>
    %5 = arith.addf %4, %2 : vector<8x256xf32>
    %c0_5 = arith.constant 0 : index
    %c0_6 = arith.constant 0 : index
    %6 = vector.load %arg6[%c0_5, %c0_6] : memref<8x1xi32, #tpu.memory_space<vmem>>, vector<8x1xi32>
    %c0_7 = arith.constant 0 : index
    %c0_8 = arith.constant 0 : index
    %7 = vector.load %arg5[%c0_7, %c0_8] : memref<1x256xi32, #tpu.memory_space<vmem>>, vector<1x256xi32>
    %8 = vector.broadcast %6 : vector<8x1xi32> to vector<8x256xi32>
    %9 = vector.broadcast %7 : vector<1x256xi32> to vector<8x256xi32>
    %10 = arith.cmpi eq, %8, %9 : vector<8x256xi32>
    %cst_9 = arith.constant 0.000000e+00 : f32
    %cst_10 = arith.constant 1.000000e+30 : f32
    %11 = arith.subf %cst_9, %cst_10 : f32
    %cst_11 = arith.constant 1.000000e+30 : f32
    %12 = vector.broadcast %cst_11 : f32 to vector<8x256xf32>
    %13 = vector.broadcast %11 : f32 to vector<8x256xf32>
    %14 = arith.select %10, %12, %13 : vector<8x256xi1>, vector<8x256xf32>
    %15 = arith.minimumf %5, %14 : vector<8x256xf32>
    %cst_12 = arith.constant dense<0xFF800000> : vector<256xf32>
    %16 = vector.multi_reduction <maximumf>, %15, %cst_12 [0] : vector<8x256xf32> to vector<256xf32>
    %17 = vector.shape_cast %16 : vector<256xf32> to vector<1x256xf32>
    %18 = arith.maximumf %5, %14 : vector<8x256xf32>
    %cst_13 = arith.constant dense<0x7F800000> : vector<256xf32>
    %19 = vector.multi_reduction <minimumf>, %18, %cst_13 [0] : vector<8x256xf32> to vector<256xf32>
    %20 = vector.shape_cast %19 : vector<256xf32> to vector<1x256xf32>
    %c0_14 = arith.constant 0 : index
    %c0_15 = arith.constant 0 : index
    %21 = vector.load %arg3[%c0_14, %c0_15] : memref<1x256xf32, #tpu.memory_space<vmem>>, vector<1x256xf32>
    %22 = arith.addf %21, %17 : vector<1x256xf32>
    %cst_16 = arith.constant 9.99999996E-13 : f32
    %23 = vector.broadcast %cst_16 : f32 to vector<1x256xf32>
    %24 = arith.maximumf %22, %23 : vector<1x256xf32>
    %25 = math.sqrt %24 : vector<1x256xf32>
    %26 = arith.addf %21, %20 : vector<1x256xf32>
    %cst_17 = arith.constant 9.99999996E-13 : f32
    %27 = vector.broadcast %cst_17 : f32 to vector<1x256xf32>
    %28 = arith.maximumf %26, %27 : vector<1x256xf32>
    %29 = math.sqrt %28 : vector<1x256xf32>
    %30 = arith.subf %25, %29 : vector<1x256xf32>
    %cst_18 = arith.constant 3.000000e-01 : f32
    %31 = vector.broadcast %cst_18 : f32 to vector<1x256xf32>
    %32 = arith.addf %30, %31 : vector<1x256xf32>
    %cst_19 = arith.constant 0.000000e+00 : f32
    %33 = vector.broadcast %cst_19 : f32 to vector<1x256xf32>
    %34 = arith.maximumf %32, %33 : vector<1x256xf32>
    %c0_20 = arith.constant 0 : index
    %c0_21 = arith.constant 0 : index
    %35 = vector.load %arg7[%c0_20, %c0_21] : memref<1x256xf32, #tpu.memory_space<vmem>>, vector<1x256xf32>
    tpu.vector_store %arg7[%c0_20, %c0_21], %34 {strides = array<i32>} : memref<1x256xf32, #tpu.memory_space<vmem>>, vector<1x256xf32>,
    return
  }
  func.func @transform_0(%arg0: i32) -> (i32, i32) {
    %c0_i32 = arith.constant 0 : i32
    %c0_i32_0 = arith.constant 0 : i32
    return %arg0, %c0_i32 : i32, i32
  }
  func.func @transform_1(%arg0: i32) -> (i32, i32) {
    %c0_i32 = arith.constant 0 : i32
    %c0_i32_0 = arith.constant 0 : i32
    %c0_i32_1 = arith.constant 0 : i32
    return %c0_i32, %c0_i32_0 : i32, i32
  }
  func.func @transform_2(%arg0: i32) -> (i32, i32) {
    %c0_i32 = arith.constant 0 : i32
    %c0_i32_0 = arith.constant 0 : i32
    return %c0_i32, %arg0 : i32, i32
  }
  func.func @transform_3(%arg0: i32) -> (i32, i32) {
    %c0_i32 = arith.constant 0 : i32
    %c0_i32_0 = arith.constant 0 : i32
    %c0_i32_1 = arith.constant 0 : i32
    return %c0_i32, %c0_i32_0 : i32, i32
  }
  func.func @transform_4(%arg0: i32) -> (i32, i32) {
    %c0_i32 = arith.constant 0 : i32
    %c0_i32_0 = arith.constant 0 : i32
    return %c0_i32, %arg0 : i32, i32
  }
  func.func @transform_5(%arg0: i32) -> (i32, i32) {
    %c0_i32 = arith.constant 0 : i32
    %c0_i32_0 = arith.constant 0 : i32
    %c0_i32_1 = arith.constant 0 : i32
    return %c0_i32, %c0_i32_0 : i32, i32
  }
  func.func @transform_6(%arg0: i32) -> (i32, i32) {
    %c0_i32 = arith.constant 0 : i32
    %c0_i32_0 = arith.constant 0 : i32
    return %c0_i32, %arg0 : i32, i32
  }
}

</mosaic_0001>

<bundles_post_ra>
// kernel: tpu_custom_call.1
= control target key start
LH: loop header
LB: loop body
LE: loop exit
PB: predicated region body
PF: predicated region fallthrough
CT: control target
= control target key end

     0   :  { %11 = vsyncpa [#allocation3], 0  ;;  %s714_s0 = inlined_call_operand.hbm [shape: f32[256,128], index: 0, kind: input, shape index: {}]   ;;  %s715_s1 = inlined_call_operand.hbm [shape: f32[8,128], index: 1, kind: input, shape index: {}]   ;;  %s716_s2 = inlined_call_operand.hbm [shape: f32[1,256], index: 2, kind: input, shape index: {}]   ;;  %s717_s3 = inlined_call_operand.hbm [shape: f32[8,1], index: 3, kind: input, shape index: {}]   ;;  %s718_s4 = inlined_call_operand.hbm [shape: s32[1,256], index: 4, kind: input, shape index: {}]   ;;  %s719_s5 = inlined_call_operand.hbm [shape: s32[8,1], index: 5, kind: input, shape index: {}]   ;;  %s720_s6 = inlined_call_operand.hbm [shape: f32[1,256], index: 6, kind: output, shape index: {}]  }
   0x1   :  { %12 = vsyncpa [#allocation6], 0 }
   0x2   :  { %13 = vsyncpa [#allocation9], 0 }
   0x3   :  { %14 = vsyncpa [#allocation12], 0 }
   0x4   :  { %15 = vsyncpa [#allocation4], 0  ;;  %s581_s21 = smov [#allocation5]   ;;  %s582_s23 = smov [#allocation8]  }
   0x5   :  { %s34_s22 = sshll.u32 %s581_s21, 4  ;;  %s54_s24 = sshll.u32 %s582_s23, 4  ;;  %s35_s22 = int_to_ptr.vmem [resolvable:$true] %s34_s22  ;;  %s55_s24 = int_to_ptr.vmem [resolvable:$true] %s54_s24 }
   0x6   :  { %s417_s27 = scalar_lea.hbm %s715_s1, 128 }
   0x7   :  { %p418_p0 = scmp.ne.s32.totalorder %s715_s1, %s417_s27  ;;  %p421_p1 = scmp.lt.u32.totalorder %s417_s27, %s715_s1 }
   0x9   :  { %p423_p2 = pnand %p421_p1, %p418_p0 }
   0xb   :  { %426 = shalt.err (!%p423_p2)
}
   0xc   :  { %s427_s8 = scalar_lea.vmem %s35_s22, 128  ;;  %p432_p4 = scmp.lt.s32.totalorder %s35_s22, %s35_s22 }
   0xd   :  { %p428_p3 = scmp.ne.s32.totalorder %s35_s22, %s427_s8  ;;  %p433_p5 = scmp.lt.s32.totalorder %s427_s8, %s427_s8 }
   0xf   :  { %p434_p6 = por %p433_p5, %p432_p4 }
  0x11   :  { %p435_p7 = pnand %p434_p6, %p428_p3 }
  0x13   :  { %438 = shalt.err (!%p435_p7)
}
  0x14   :  { %37 = dma.hbm_to_vmem [thread:$0]  %s715_s1, 128, %s35_s22, [#allocation6]  }
  0x15   :  { %s439_s13 = scalar_lea.hbm %s717_s3, 128 }
  0x16   :  { %p440_p8 = scmp.ne.s32.totalorder %s717_s3, %s439_s13  ;;  %p443_p9 = scmp.lt.u32.totalorder %s439_s13, %s717_s3 }
  0x18   :  { %p445_p10 = pnand %p443_p9, %p440_p8 }
  0x1a   :  { %448 = shalt.err (!%p445_p10)
}
  0x1b   :  { %s449_s18 = scalar_lea.vmem %s55_s24, 128  ;;  %p454_p12 = scmp.lt.s32.totalorder %s55_s24, %s55_s24 }
  0x1c   :  { %p450_p11 = scmp.ne.s32.totalorder %s55_s24, %s449_s18  ;;  %p455_p13 = scmp.lt.s32.totalorder %s449_s18, %s449_s18 }
  0x1e   :  { %p456_p0 = por %p455_p13, %p454_p12 }
  0x20   :  { %p457_p1 = pnand %p456_p0, %p450_p11 }
  0x22   :  { %460 = shalt.err (!%p457_p1)
}
  0x23   :  { %57 = dma.hbm_to_vmem [thread:$0]  %s717_s3, 128, %s55_s24, [#allocation9]  }
  0x24   :  { %s583_s20 = smov [#allocation2]   ;;  %s461_s25 = scalar_lea.hbm %s714_s0, 4096 }
  0x25   :  { %s21_s21 = sshll.u32 %s583_s20, 4  ;;  %p462_p2 = scmp.ne.s32.totalorder %s714_s0, %s461_s25  ;;  %s22_s21 = int_to_ptr.vmem [resolvable:$true] %s21_s21 }
  0x26   :  { %p465_p3 = scmp.lt.u32.totalorder %s461_s25, %s714_s0 }
  0x28   :  { %p467_p4 = pnand %p465_p3, %p462_p2 }
  0x2a   :  { %470 = shalt.err (!%p467_p4)
}
  0x2b   :  { %s471_s30 = scalar_lea.vmem %s22_s21, 4096  ;;  %p476_p6 = scmp.lt.s32.totalorder %s22_s21, %s22_s21 }
  0x2c   :  { %p472_p5 = scmp.ne.s32.totalorder %s22_s21, %s471_s30  ;;  %p477_p7 = scmp.lt.s32.totalorder %s471_s30, %s471_s30 }
  0x2e   :  { %p478_p8 = por %p477_p7, %p476_p6 }
  0x30   :  { %p479_p9 = pnand %p478_p8, %p472_p5 }
  0x32   :  { %482 = shalt.err (!%p479_p9)
}
  0x33   :  { %s584_s3 = smov 128   ;;  %s585_s24 = smov 8  }
  0x34   :  { %27 = dma.hbm_to_vmem [thread:$0]  %s714_s0, 4096, %s22_s21, [#allocation3], %s584_s3, %s584_s3, %s585_s24  }
  0x35   :  { %s586_s9 = smov [#allocation7]   ;;  %s587_s11 = smov [#allocation10]  }
  0x36   :  { %s44_s10 = sshll.u32 %s586_s9, 4  ;;  %s64_s12 = sshll.u32 %s587_s11, 4  ;;  %s45_s10 = int_to_ptr.vmem [resolvable:$true] %s44_s10  ;;  %s65_s12 = int_to_ptr.vmem [resolvable:$true] %s64_s12 }
  0x37   :  { %s483_s15 = scalar_lea.hbm %s716_s2, 32 }
  0x38   :  { %p484_p10 = scmp.ne.s32.totalorder %s716_s2, %s483_s15  ;;  %p487_p11 = scmp.lt.u32.totalorder %s483_s15, %s716_s2 }
  0x3a   :  { %p489_p12 = pnand %p487_p11, %p484_p10 }
  0x3c   :  { %492 = shalt.err (!%p489_p12)
}
  0x3d   :  { %s493_s0 = scalar_lea.vmem %s45_s10, 32  ;;  %p498_p0 = scmp.lt.s32.totalorder %s45_s10, %s45_s10 }
  0x3e   :  { %p494_p13 = scmp.ne.s32.totalorder %s45_s10, %s493_s0  ;;  %p499_p1 = scmp.lt.s32.totalorder %s493_s0, %s493_s0 }
  0x40   :  { %p500_p2 = por %p499_p1, %p498_p0 }
  0x42   :  { %p501_p3 = pnand %p500_p2, %p494_p13 }
  0x44   :  { %504 = shalt.err (!%p501_p3)
}
  0x45   :  { %47 = dma.hbm_to_vmem [thread:$0]  %s716_s2, 32, %s45_s10, [#allocation6]  }
  0x46   :  { %s505_s23 = scalar_lea.hbm %s718_s4, 32 }
  0x47   :  { %p506_p4 = scmp.ne.s32.totalorder %s718_s4, %s505_s23  ;;  %p509_p5 = scmp.lt.u32.totalorder %s505_s23, %s718_s4 }
  0x49   :  { %p511_p6 = pnand %p509_p5, %p506_p4 }
  0x4b   :  { %514 = shalt.err (!%p511_p6)
}
  0x4c   :  { %s515_s29 = scalar_lea.vmem %s65_s12, 32  ;;  %p520_p8 = scmp.lt.s32.totalorder %s65_s12, %s65_s12 }
  0x4d   :  { %p516_p7 = scmp.ne.s32.totalorder %s65_s12, %s515_s29  ;;  %p521_p9 = scmp.lt.s32.totalorder %s515_s29, %s515_s29 }
  0x4f   :  { %p522_p10 = por %p521_p9, %p520_p8 }
  0x51   :  { %p523_p11 = pnand %p522_p10, %p516_p7 }
  0x53   :  { %526 = shalt.err (!%p523_p11)
}
  0x54   :  { %67 = dma.hbm_to_vmem [thread:$0]  %s718_s4, 32, %s65_s12, [#allocation9]  }
  0x55   :  { %s588_s3 = smov [#allocation11]   ;;  %s527_s9 = scalar_lea.hbm %s719_s5, 128 }
  0x56   :  { %s74_s24 = sshll.u32 %s588_s3, 4  ;;  %p528_p12 = scmp.ne.s32.totalorder %s719_s5, %s527_s9  ;;  %s75_s24 = int_to_ptr.vmem [resolvable:$true] %s74_s24 }
  0x57   :  { %p531_p13 = scmp.lt.u32.totalorder %s527_s9, %s719_s5 }
  0x59   :  { %p533_p0 = pnand %p531_p13, %p528_p12 }
  0x5b   :  { %536 = shalt.err (!%p533_p0)
}
  0x5c   :  { %s537_s15 = scalar_lea.vmem %s75_s24, 128  ;;  %p542_p2 = scmp.lt.s32.totalorder %s75_s24, %s75_s24 }
  0x5d   :  { %p538_p1 = scmp.ne.s32.totalorder %s75_s24, %s537_s15  ;;  %p543_p3 = scmp.lt.s32.totalorder %s537_s15, %s537_s15 }
  0x5f   :  { %p544_p4 = por %p543_p3, %p542_p2 }
  0x61   :  { %p545_p5 = pnand %p544_p4, %p538_p1 }
  0x63   :  { %548 = shalt.err (!%p545_p5)
}
  0x64   :  { %77 = dma.hbm_to_vmem [thread:$0]  %s719_s5, 128, %s75_s24, [#allocation12]  }
  0x65   :  { %571 = dma.done.wait [#allocation3], 4096  }
  0x66   :  { %572 = vsyncadd [#allocation3], 4294963200 }
  0x67   :  { %573 = dma.done.wait [#allocation6], 160  }
  0x68   :  { %574 = vsyncadd [#allocation6], 4294967136 }
  0x69   :  { %575 = dma.done.wait [#allocation9], 160  }
  0x6a   :  { %576 = vsyncadd [#allocation9], 4294967136 }
  0x6b   :  { %577 = dma.done.wait [#allocation12], 128  }
  0x6c   :  { %578 = vsyncadd [#allocation12], 4294967168  ;;  %v589_v0 = vmov 0   ;;  %v113_v1 = vld [vmem:[#allocation2 + $0x80] sm:$0xff]  ;;  %v114_v2 = vld [vmem:[#allocation2 + $0x88] sm:$0xff]  ;;  %v213_v52 = vlaneseq  ;;  %s592_s5 = smov [#allocation13]  }
  0x6d   :  { %412 = vset.pattern.permute.xlu0 %v589_v0  ;;  %v97_v3 = vld [vmem:[#allocation2] sm:$0xff]  ;;  %v368_v4 = vpack.c.bf16 %v114_v2, %v113_v1  ;;  %v98_v5 = vld [vmem:[#allocation2 + $0x8] sm:$0xff]  ;;  %v115_v6 = vld [vmem:[#allocation2 + $0x90] sm:$0xff]  ;;  %v590_v0 = vmov -1e+30   ;;  %s322_s16 = sshll.u32 %s592_s5, 4  ;;  %s323_s16 = int_to_ptr.vmem [resolvable:$true] %s322_s16 }
  0x6e   :  { %v116_v7 = vld [vmem:[#allocation2 + $0x98] sm:$0xff]  ;;  %v370_v8 = vpack.c.bf16 %v98_v5, %v97_v3  ;;  %v99_v10 = vld [vmem:[#allocation2 + $0x10] sm:$0xff]  ;;  %v117_v12 = vld [vmem:[#allocation2 + $0xa0] sm:$0xff]  ;;  %v214_v53 = vshrl.u32 %v213_v52, 7  ;;  %vm313_vm6 = vcmp.lt.s32.totalorder %v213_v52, 256  ;;  %s549_s17 = scalar_lea.vmem %s323_s16, 32  ;;  %p554_p7 = scmp.lt.s32.totalorder %s323_s16, %s323_s16 }
  0x6f   :  { %v372_v9 = vpack.c.bf16 %v116_v7, %v115_v6  ;;  %369 = vmatprep.subr.bf16.mxu0 %v368_v4  ;;  %v100_v11 = vld [vmem:[#allocation2 + $0x18] sm:$0xff]  ;;  %v118_v13 = vld [vmem:[#allocation2 + $0xa8] sm:$0xff]  ;;  %v96_v16 = vld [vmem:[#allocation5] sm:$0xff]  ;;  %p550_p6 = scmp.ne.s32.totalorder %s323_s16, %s549_s17  ;;  %p555_p8 = scmp.lt.s32.totalorder %s549_s17, %s549_s17 }
  0x70   :  { %371 = vmatpush3.bf16.xpose.msra.mxu0 %v370_v8  ;;  %v374_v14 = vpack.c.bf16 %v100_v11, %v99_v10  ;;  %v376_v15 = vpack.c.bf16 %v118_v13, %v117_v12  ;;  %366 = vmatprep.mubr.f32.mxu0 %v96_v16  ;;  %v200_v17 = vld [vmem:[#allocation8] sm:$0xff]  ;;  %v101_v18 = vld [vmem:[#allocation2 + $0x20] sm:$0xff]  ;;  %v208_v20 = vld [vmem:[#allocation11] sm:$0xff]  ;;  %v215_v55 = vsub.s32 0, %v214_v53  ;;  %v219_v57 = vsub.s32 1, %v214_v53 }
  0x71   :  { %373 = vmatprep.subr.bf16.mxu0 %v372_v9  ;;  %203 = vperm.xlu0 %412, %v200_v17   ;;  %v102_v19 = vld [vmem:[#allocation2 + $0x28] sm:$0xff]  ;;  %v119_v21 = vld [vmem:[#allocation2 + $0xb0] sm:$0xff]  ;;  %v120_v22 = vld [vmem:[#allocation2 + $0xb8] sm:$0xff]  ;;  %p556_p9 = por %p555_p8, %p554_p7 }
  0x72   :  { %v378_v23 = vpack.c.bf16 %v102_v19, %v101_v18  ;;  %v380_v24 = vpack.c.bf16 %v120_v22, %v119_v21  ;;  %v103_v25 = vld [vmem:[#allocation2 + $0x30] sm:$0xff]  ;;  %v104_v26 = vld [vmem:[#allocation2 + $0x38] sm:$0xff]  ;;  %v121_v27 = vld [vmem:[#allocation2 + $0xc0] sm:$0xff] }
  0x73   :  { %v122_v28 = vld [vmem:[#allocation2 + $0xc8] sm:$0xff]  ;;  %v382_v29 = vpack.c.bf16 %v104_v26, %v103_v25  ;;  %v105_v31 = vld [vmem:[#allocation2 + $0x40] sm:$0xff]  ;;  %v123_v33 = vld [vmem:[#allocation2 + $0xd0] sm:$0xff]  ;;  %p557_p10 = pnand %p556_p9, %p550_p6 }
  0x74   :  { %v384_v30 = vpack.c.bf16 %v122_v28, %v121_v27  ;;  %v106_v32 = vld [vmem:[#allocation2 + $0x48] sm:$0xff]  ;;  %v124_v34 = vld [vmem:[#allocation2 + $0xd8] sm:$0xff]  ;;  %v107_v37 = vld [vmem:[#allocation2 + $0x50] sm:$0xff] }
  0x75   :  { %211 = vperm.xlu0 %412, %v208_v20   ;;  %v386_v35 = vpack.c.bf16 %v106_v32, %v105_v31  ;;  %v388_v36 = vpack.c.bf16 %v124_v34, %v123_v33  ;;  %v108_v38 = vld [vmem:[#allocation2 + $0x58] sm:$0xff]  ;;  %v125_v39 = vld [vmem:[#allocation2 + $0xe0] sm:$0xff]  ;;  %v126_v40 = vld [vmem:[#allocation2 + $0xe8] sm:$0xff] }
  0x76   :  { %v390_v41 = vpack.c.bf16 %v108_v38, %v107_v37  ;;  %v392_v42 = vpack.c.bf16 %v126_v40, %v125_v39  ;;  %v109_v43 = vld [vmem:[#allocation2 + $0x60] sm:$0xff]  ;;  %v110_v44 = vld [vmem:[#allocation2 + $0x68] sm:$0xff]  ;;  %v127_v45 = vld [vmem:[#allocation2 + $0xf0] sm:$0xff] }
  0x77   :  { %v128_v46 = vld [vmem:[#allocation2 + $0xf8] sm:$0xff]  ;;  %v394_v47 = vpack.c.bf16 %v110_v44, %v109_v43  ;;  %v111_v49 = vld [vmem:[#allocation2 + $0x70] sm:$0xff]  ;;  %v253_v40 = vld [vmem:[#allocation7] sm:$0x3] }
  0x78   :  { %375 = vmatpush3.bf16.xpose.msra.mxu0 %v374_v14  ;;  %v396_v48 = vpack.c.bf16 %v128_v46, %v127_v45  ;;  %v112_v50 = vld [vmem:[#allocation2 + $0x78] sm:$0xff]  ;;  %v209_v56 = vld [vmem:[#allocation10] sm:$0x3]  ;;  %v591_v14 = vmov 1966171168  }
  0x79   :  { %377 = vmatprep.subr.bf16.mxu0 %v376_v15  ;;  %v398_v51 = vpack.c.bf16 %v112_v50, %v111_v49  ;;  %v216_v58 = vrot.slane %v209_v56, %v215_v55  ;;  %v220_v59 = vrot.slane %v209_v56, %v219_v57  ;;  %v258_v15 = vunpack.c.l.s4 %v591_v14 }
  0x80   :  { %379 = vmatpush3.bf16.xpose.msra.mxu0 %v378_v23 }
  0x81   :  { %381 = vmatprep.subr.bf16.mxu0 %v380_v24  ;;  %v259_v24 = vunpack.c.0.s8 %v258_v15 }
  0x83   :  { %v262_v33 = vsub.s32 %v259_v24, %v214_v53 }
  0x88   :  { %383 = vmatpush3.bf16.xpose.msra.mxu0 %v382_v29 }
  0x89   :  { %385 = vmatprep.subr.bf16.mxu0 %v384_v30 }
  0x90   :  { %387 = vmatpush3.bf16.xpose.msra.mxu0 %v386_v35 }
  0x91   :  { %389 = vmatprep.subr.bf16.mxu0 %v388_v36 }
  0x98   :  { %391 = vmatpush3.bf16.xpose.msra.mxu0 %v390_v41 }
  0x99   :  { %393 = vmatprep.subr.bf16.mxu0 %v392_v42 }
  0xa0   :  { %395 = vmatpush3.bf16.xpose.msra.mxu0 %v394_v47 }
  0xa1   :  { %397 = vmatprep.subr.bf16.mxu0 %v396_v48 }
  0xa8   :  { %399 = vmatpush3.bf16.xpose.msra.mxu0 %v398_v51 }
  0xaf   :  { %367 = vmatmul.mubr.f32.vlgmr.msra.gmra.mrb[0].mxu0 %v96_v16 }
  0xf0   :  { %v204_v54 = vpop.permute.xlu0 %203 }
  0xf4   :  { %v212_v60 = vpop.permute.xlu0 %211 }
  0xf5   :  { %vm221_vm0 = vcmp.eq.s32.totalorder %v212_v60, %v216_v58  ;;  %vm222_vm1 = vcmp.eq.s32.totalorder %v212_v60, %v220_v59 }
  0xf6   :  { %v223_v1 = vsel %vm221_vm0, 1e+30, %v590_v0  ;;  %v224_v3 = vsel %vm222_vm1, 1e+30, %v590_v0 }
 0x182   :  { %v195_v61 = vpop.f32.mrb[0].mxu0 }
 0x183   :  { %v206_v62 = vadd.f32 %v204_v54, %v195_v61  ;;  %v197_v63 = vpop.f32.mrb[1].mxu0 }
 0x184   :  { %v207_v2 = vadd.f32 %v204_v54, %v197_v63 }
 0x185   :  { %v225_v4 = vmin.f32 %v206_v62, %v223_v1  ;;  %v239_v5 = vmax.f32 %v206_v62, %v223_v1 }
 0x186   :  { %v226_v6 = vmin.f32 %v207_v2, %v224_v3  ;;  %v240_v7 = vmax.f32 %v207_v2, %v224_v3 }
 0x187   :  { %v227_v8 = vrot.slane %v225_v4, 4  ;;  %v241_v9 = vrot.slane %v239_v5, 4 }
 0x188   :  { %v233_v10 = vrot.slane %v226_v6, 4  ;;  %v247_v11 = vrot.slane %v240_v7, 4 }
 0x189   :  { %v228_v12 = vmax.f32 %v225_v4, %v227_v8  ;;  %v242_v13 = vmin.f32 %v239_v5, %v241_v9 }
 0x18a   :  { %v234_v16 = vmax.f32 %v226_v6, %v233_v10  ;;  %v248_v17 = vmin.f32 %v240_v7, %v247_v11 }
 0x18b   :  { %v229_v18 = vrot.slane %v228_v12, 2  ;;  %v243_v19 = vrot.slane %v242_v13, 2 }
 0x18c   :  { %v235_v20 = vrot.slane %v234_v16, 2  ;;  %v249_v21 = vrot.slane %v248_v17, 2 }
 0x18d   :  { %v230_v22 = vmax.f32 %v228_v12, %v229_v18  ;;  %v244_v23 = vmin.f32 %v242_v13, %v243_v19 }
 0x18e   :  { %v236_v25 = vmax.f32 %v234_v16, %v235_v20  ;;  %v250_v26 = vmin.f32 %v248_v17, %v249_v21 }
 0x18f   :  { %v231_v27 = vrot.slane %v230_v22, 1  ;;  %v245_v28 = vrot.slane %v244_v23, 1 }
 0x190   :  { %v237_v29 = vrot.slane %v236_v25, 1  ;;  %v251_v30 = vrot.slane %v250_v26, 1 }
 0x191   :  { %v232_v31 = vmax.f32 %v230_v22, %v231_v27  ;;  %v246_v32 = vmin.f32 %v244_v23, %v245_v28 }
 0x192   :  { %v238_v34 = vmax.f32 %v236_v25, %v237_v29  ;;  %v252_v35 = vmin.f32 %v250_v26, %v251_v30 }
 0x194   :  { %v256_v36 = vcombine.low %v232_v31, %v238_v34  ;;  %v283_v37 = vcombine.low %v246_v32, %v252_v35 }
 0x196   :  { %v263_v38 = vrot.slane %v256_v36, %v262_v33  ;;  %v290_v39 = vrot.slane %v283_v37, %v262_v33 }
 0x198   :  { %v270_v41 = vrot.slane %v263_v38, %v262_v33  ;;  %v297_v42 = vrot.slane %v290_v39, %v262_v33 }
 0x19a   :  { %v272_v43 = vadd.f32 %v270_v41, %v253_v40  ;;  %v299_v44 = vadd.f32 %v297_v42, %v253_v40 }
 0x19c   :  { %v273_v45 = vmax.f32 %v272_v43, 1e-12  ;;  %v300_v46 = vmax.f32 %v299_v44, 1e-12 }
 0x19e   :  { %413 = vrsqrt.f32 %v273_v45  ;;  %vm276_vm2 = vcmp.eq.f32.partialorder %v273_v45, inf  ;;  %v279_v50 = vand.u32 2147483648, %v273_v45  ;;  %vm278_vm3 = vcmp.eq.f32.partialorder %v273_v45, 0.0 }
 0x19f   :  { %415 = vrsqrt.f32 %v300_v46  ;;  %vm303_vm4 = vcmp.eq.f32.partialorder %v300_v46, inf  ;;  %v306_v54 = vand.u32 2147483648, %v300_v46  ;;  %vm305_vm5 = vcmp.eq.f32.partialorder %v300_v46, 0.0 }
 0x1a8   :  { %v414_v47 = vpop.eup %413 }
 0x1a9   :  { %v416_v48 = vpop.eup %415  ;;  %v275_v49 = vmul.f32 %v414_v47, %v273_v45 }
 0x1aa   :  { %v302_v51 = vmul.f32 %v416_v48, %v300_v46 }
 0x1ab   :  { %v277_v53 = vsel %vm276_vm2, %v273_v45, %v275_v49 }
 0x1ac   :  { %v280_v55 = vsel %vm278_vm3, %v279_v50, %v277_v53  ;;  %v304_v56 = vsel %vm303_vm4, %v300_v46, %v302_v51 }
 0x1ad   :  { %v307_v57 = vsel %vm305_vm5, %v306_v54, %v304_v56 }
 0x1ae   :  { %v308_v58 = vsub.f32 %v280_v55, %v307_v57 }
 0x1b0   :  { %v309_v59 = vadd.f32 0.3, %v308_v58 }
 0x1b2   :  { %v310_v60 = vmax.f32 %v309_v59, 0.0 }
 0x1b4   :  { %315 = vst.msk [vmem:[#allocation13] sm:$0x3] %vm313_vm6, %v310_v60 }
 0x1b5   :  { %560 = shalt.err (!%p557_p10)
}
 0x1b6   :  { %s561_s0 = scalar_lea.hbm %s720_s6, 32 }
 0x1b7   :  { %p562_p11 = scmp.ne.s32.totalorder %s720_s6, %s561_s0  ;;  %p565_p12 = scmp.lt.u32.totalorder %s561_s0, %s720_s6 }
 0x1b9   :  { %p567_p13 = pnand %p565_p12, %p562_p11 }
 0x1bb   :  { %570 = shalt.err (!%p567_p13)
}
 0x1bc   :  { %325 = dma.vmem_to_hbm [thread:$0]  %s323_s16, 32, %s720_s6, [#allocation4]  }
 0x1bd   :  { %579 = dma.done.wait [#allocation4], 32  }
 0x1be   :  { %580 = vsyncadd [#allocation4], 4294967264 }
 0x1bf   :  { %329 = vsyncpa [#allocation3], 1 }
 0x1c0   :  { %330 = vsyncpa [#allocation6], 1 }
 0x1c1   :  { %331 = vsyncpa [#allocation9], 1 }
 0x1c2   :  { %332 = vsyncpa [#allocation12], 1 }
 0x1c3   :  { %333 = vsyncpa [#allocation4], 1 }

// kernel: tpu_custom_call.1
= control target key start
LH: loop header
LB: loop body
LE: loop exit
PB: predicated region body
PF: predicated region fallthrough
CT: control target
= control target key end

     0   :  { %11 = vsyncpa [#allocation3], 0  ;;  %s714_s0 = inlined_call_operand.hbm [shape: f32[256,128], index: 0, kind: input, shape index: {}]   ;;  %s715_s1 = inlined_call_operand.hbm [shape: f32[8,128], index: 1, kind: input, shape index: {}]   ;;  %s716_s2 = inlined_call_operand.hbm [shape: f32[1,256], index: 2, kind: input, shape index: {}]   ;;  %s717_s3 = inlined_call_operand.hbm [shape: f32[8,1], index: 3, kind: input, shape index: {}]   ;;  %s718_s4 = inlined_call_operand.hbm [shape: s32[1,256], index: 4, kind: input, shape index: {}]   ;;  %s719_s5 = inlined_call_operand.hbm [shape: s32[8,1], index: 5, kind: input, shape index: {}]   ;;  %s720_s6 = inlined_call_operand.hbm [shape: f32[1,256], index: 6, kind: output, shape index: {}]  }
   0x1   :  { %12 = vsyncpa [#allocation6], 0 }
   0x2   :  { %13 = vsyncpa [#allocation9], 0 }
   0x3   :  { %14 = vsyncpa [#allocation12], 0 }
   0x4   :  { %15 = vsyncpa [#allocation4], 0  ;;  %s581_s21 = smov [#allocation5]   ;;  %s582_s23 = smov [#allocation8]  }
   0x5   :  { %s34_s22 = sshll.u32 %s581_s21, 4  ;;  %s54_s24 = sshll.u32 %s582_s23, 4  ;;  %s35_s22 = int_to_ptr.vmem [resolvable:$true] %s34_s22  ;;  %s55_s24 = int_to_ptr.vmem [resolvable:$true] %s54_s24 }
   0x6   :  { %s417_s27 = scalar_lea.hbm %s715_s1, 128 }
   0x7   :  { %p418_p0 = scmp.ne.s32.totalorder %s715_s1, %s417_s27  ;;  %p421_p1 = scmp.lt.u32.totalorder %s417_s27, %s715_s1 }
   0x9   :  { %p423_p2 = pnand %p421_p1, %p418_p0 }
   0xb   :  { %426 = shalt.err (!%p423_p2)
}
   0xc   :  { %s427_s8 = scalar_lea.vmem %s35_s22, 128  ;;  %p432_p4 = scmp.lt.s32.totalorder %s35_s22, %s35_s22 }
   0xd   :  { %p428_p3 = scmp.ne.s32.totalorder %s35_s22, %s427_s8  ;;  %p433_p5 = scmp.lt.s32.totalorder %s427_s8, %s427_s8 }
   0xf   :  { %p434_p6 = por %p433_p5, %p432_p4 }
  0x11   :  { %p435_p7 = pnand %p434_p6, %p428_p3 }
  0x13   :  { %438 = shalt.err (!%p435_p7)
}
  0x14   :  { %37 = dma.hbm_to_vmem [thread:$0]  %s715_s1, 128, %s35_s22, [#allocation6]  }
  0x15   :  { %s439_s13 = scalar_lea.hbm %s717_s3, 128 }
  0x16   :  { %p440_p8 = scmp.ne.s32.totalorder %s717_s3, %s439_s13  ;;  %p443_p9 = scmp.lt.u32.totalorder %s439_s13, %s717_s3 }
  0x18   :  { %p445_p10 = pnand %p443_p9, %p440_p8 }
  0x1a   :  { %448 = shalt.err (!%p445_p10)
}
  0x1b   :  { %s449_s18 = scalar_lea.vmem %s55_s24, 128  ;;  %p454_p12 = scmp.lt.s32.totalorder %s55_s24, %s55_s24 }
  0x1c   :  { %p450_p11 = scmp.ne.s32.totalorder %s55_s24, %s449_s18  ;;  %p455_p13 = scmp.lt.s32.totalorder %s449_s18, %s449_s18 }
  0x1e   :  { %p456_p0 = por %p455_p13, %p454_p12 }
  0x20   :  { %p457_p1 = pnand %p456_p0, %p450_p11 }
  0x22   :  { %460 = shalt.err (!%p457_p1)
}
  0x23   :  { %57 = dma.hbm_to_vmem [thread:$0]  %s717_s3, 128, %s55_s24, [#allocation9]  }
  0x24   :  { %s583_s20 = smov [#allocation2]   ;;  %s461_s25 = scalar_lea.hbm %s714_s0, 4096 }
  0x25   :  { %s21_s21 = sshll.u32 %s583_s20, 4  ;;  %p462_p2 = scmp.ne.s32.totalorder %s714_s0, %s461_s25  ;;  %s22_s21 = int_to_ptr.vmem [resolvable:$true] %s21_s21 }
  0x26   :  { %p465_p3 = scmp.lt.u32.totalorder %s461_s25, %s714_s0 }
  0x28   :  { %p467_p4 = pnand %p465_p3, %p462_p2 }
  0x2a   :  { %470 = shalt.err (!%p467_p4)
}
  0x2b   :  { %s471_s30 = scalar_lea.vmem %s22_s21, 4096  ;;  %p476_p6 = scmp.lt.s32.totalorder %s22_s21, %s22_s21 }
  0x2c   :  { %p472_p5 = scmp.ne.s32.totalorder %s22_s21, %s471_s30  ;;  %p477_p7 = scmp.lt.s32.totalorder %s471_s30, %s471_s30 }
  0x2e   :  { %p478_p8 = por %p477_p7, %p476_p6 }
  0x30   :  { %p479_p9 = pnand %p478_p8, %p472_p5 }
  0x32   :  { %482 = shalt.err (!%p479_p9)
}
  0x33   :  { %s584_s3 = smov 128   ;;  %s585_s24 = smov 8  }
  0x34   :  { %27 = dma.hbm_to_vmem [thread:$0]  %s714_s0, 4096, %s22_s21, [#allocation3], %s584_s3, %s584_s3, %s585_s24  }
  0x35   :  { %s586_s9 = smov [#allocation7]   ;;  %s587_s11 = smov [#allocation10]  }
  0x36   :  { %s44_s10 = sshll.u32 %s586_s9, 4  ;;  %s64_s12 = sshll.u32 %s587_s11, 4  ;;  %s45_s10 = int_to_ptr.vmem [resolvable:$true] %s44_s10  ;;  %s65_s12 = int_to_ptr.vmem [resolvable:$true] %s64_s12 }
  0x37   :  { %s483_s15 = scalar_lea.hbm %s716_s2, 32 }
  0x38   :  { %p484_p10 = scmp.ne.s32.totalorder %s716_s2, %s483_s15  ;;  %p487_p11 = scmp.lt.u32.totalorder %s483_s15, %s716_s2 }
  0x3a   :  { %p489_p12 = pnand %p487_p11, %p484_p10 }
  0x3c   :  { %492 = shalt.err (!%p489_p12)
}
  0x3d   :  { %s493_s0 = scalar_lea.vmem %s45_s10, 32  ;;  %p498_p0 = scmp.lt.s32.totalorder %s45_s10, %s45_s10 }
  0x3e   :  { %p494_p13 = scmp.ne.s32.totalorder %s45_s10, %s493_s0  ;;  %p499_p1 = scmp.lt.s32.totalorder %s493_s0, %s493_s0 }
  0x40   :  { %p500_p2 = por %p499_p1, %p498_p0 }
  0x42   :  { %p501_p3 = pnand %p500_p2, %p494_p13 }
  0x44   :  { %504 = shalt.err (!%p501_p3)
}
  0x45   :  { %47 = dma.hbm_to_vmem [thread:$0]  %s716_s2, 32, %s45_s10, [#allocation6]  }
  0x46   :  { %s505_s23 = scalar_lea.hbm %s718_s4, 32 }
  0x47   :  { %p506_p4 = scmp.ne.s32.totalorder %s718_s4, %s505_s23  ;;  %p509_p5 = scmp.lt.u32.totalorder %s505_s23, %s718_s4 }
  0x49   :  { %p511_p6 = pnand %p509_p5, %p506_p4 }
  0x4b   :  { %514 = shalt.err (!%p511_p6)
}
  0x4c   :  { %s515_s29 = scalar_lea.vmem %s65_s12, 32  ;;  %p520_p8 = scmp.lt.s32.totalorder %s65_s12, %s65_s12 }
  0x4d   :  { %p516_p7 = scmp.ne.s32.totalorder %s65_s12, %s515_s29  ;;  %p521_p9 = scmp.lt.s32.totalorder %s515_s29, %s515_s29 }
  0x4f   :  { %p522_p10 = por %p521_p9, %p520_p8 }
  0x51   :  { %p523_p11 = pnand %p522_p10, %p516_p7 }
  0x53   :  { %526 = shalt.err (!%p523_p11)
}
  0x54   :  { %67 = dma.hbm_to_vmem [thread:$0]  %s718_s4, 32, %s65_s12, [#allocation9]  }
  0x55   :  { %s588_s3 = smov [#allocation11]   ;;  %s527_s9 = scalar_lea.hbm %s719_s5, 128 }
  0x56   :  { %s74_s24 = sshll.u32 %s588_s3, 4  ;;  %p528_p12 = scmp.ne.s32.totalorder %s719_s5, %s527_s9  ;;  %s75_s24 = int_to_ptr.vmem [resolvable:$true] %s74_s24 }
  0x57   :  { %p531_p13 = scmp.lt.u32.totalorder %s527_s9, %s719_s5 }
  0x59   :  { %p533_p0 = pnand %p531_p13, %p528_p12 }
  0x5b   :  { %536 = shalt.err (!%p533_p0)
}
  0x5c   :  { %s537_s15 = scalar_lea.vmem %s75_s24, 128  ;;  %p542_p2 = scmp.lt.s32.totalorder %s75_s24, %s75_s24 }
  0x5d   :  { %p538_p1 = scmp.ne.s32.totalorder %s75_s24, %s537_s15  ;;  %p543_p3 = scmp.lt.s32.totalorder %s537_s15, %s537_s15 }
  0x5f   :  { %p544_p4 = por %p543_p3, %p542_p2 }
  0x61   :  { %p545_p5 = pnand %p544_p4, %p538_p1 }
  0x63   :  { %548 = shalt.err (!%p545_p5)
}
  0x64   :  { %77 = dma.hbm_to_vmem [thread:$0]  %s719_s5, 128, %s75_s24, [#allocation12]  }
  0x65   :  { %571 = dma.done.wait [#allocation3], 4096  }
  0x66   :  { %572 = vsyncadd [#allocation3], 4294963200 }
  0x67   :  { %573 = dma.done.wait [#allocation6], 160  }
  0x68   :  { %574 = vsyncadd [#allocation6], 4294967136 }
  0x69   :  { %575 = dma.done.wait [#allocation9], 160  }
  0x6a   :  { %576 = vsyncadd [#allocation9], 4294967136 }
  0x6b   :  { %577 = dma.done.wait [#allocation12], 128  }
  0x6c   :  { %578 = vsyncadd [#allocation12], 4294967168  ;;  %v589_v0 = vmov 0   ;;  %v113_v1 = vld [vmem:[#allocation2 + $0x80] sm:$0xff]  ;;  %v114_v2 = vld [vmem:[#allocation2 + $0x88] sm:$0xff]  ;;  %v213_v52 = vlaneseq  ;;  %s592_s5 = smov [#allocation13]  }
  0x6d   :  { %412 = vset.pattern.permute.xlu0 %v589_v0  ;;  %v97_v3 = vld [vmem:[#allocation2] sm:$0xff]  ;;  %v368_v4 = vpack.c.bf16 %v114_v2, %v113_v1  ;;  %v98_v5 = vld [vmem:[#allocation2 + $0x8] sm:$0xff]  ;;  %v115_v6 = vld [vmem:[#allocation2 + $0x90] sm:$0xff]  ;;  %v590_v0 = vmov -1e+30   ;;  %s322_s16 = sshll.u32 %s592_s5, 4  ;;  %s323_s16 = int_to_ptr.vmem [resolvable:$true] %s322_s16 }
  0x6e   :  { %v116_v7 = vld [vmem:[#allocation2 + $0x98] sm:$0xff]  ;;  %v370_v8 = vpack.c.bf16 %v98_v5, %v97_v3  ;;  %v99_v10 = vld [vmem:[#allocation2 + $0x10] sm:$0xff]  ;;  %v117_v12 = vld [vmem:[#allocation2 + $0xa0] sm:$0xff]  ;;  %v214_v53 = vshrl.u32 %v213_v52, 7  ;;  %vm313_vm6 = vcmp.lt.s32.totalorder %v213_v52, 256  ;;  %s549_s17 = scalar_lea.vmem %s323_s16, 32  ;;  %p554_p7 = scmp.lt.s32.totalorder %s323_s16, %s323_s16 }
  0x6f   :  { %v372_v9 = vpack.c.bf16 %v116_v7, %v115_v6  ;;  %369 = vmatprep.subr.bf16.mxu0 %v368_v4  ;;  %v100_v11 = vld [vmem:[#allocation2 + $0x18] sm:$0xff]  ;;  %v118_v13 = vld [vmem:[#allocation2 + $0xa8] sm:$0xff]  ;;  %v96_v16 = vld [vmem:[#allocation5] sm:$0xff]  ;;  %p550_p6 = scmp.ne.s32.totalorder %s323_s16, %s549_s17  ;;  %p555_p8 = scmp.lt.s32.totalorder %s549_s17, %s549_s17 }
  0x70   :  { %371 = vmatpush3.bf16.xpose.msra.mxu0 %v370_v8  ;;  %v374_v14 = vpack.c.bf16 %v100_v11, %v99_v10  ;;  %v376_v15 = vpack.c.bf16 %v118_v13, %v117_v12  ;;  %366 = vmatprep.mubr.f32.mxu0 %v96_v16  ;;  %v200_v17 = vld [vmem:[#allocation8] sm:$0xff]  ;;  %v101_v18 = vld [vmem:[#allocation2 + $0x20] sm:$0xff]  ;;  %v208_v20 = vld [vmem:[#allocation11] sm:$0xff]  ;;  %v215_v55 = vsub.s32 0, %v214_v53  ;;  %v219_v57 = vsub.s32 1, %v214_v53 }
  0x71   :  { %373 = vmatprep.subr.bf16.mxu0 %v372_v9  ;;  %203 = vperm.xlu0 %412, %v200_v17   ;;  %v102_v19 = vld [vmem:[#allocation2 + $0x28] sm:$0xff]  ;;  %v119_v21 = vld [vmem:[#allocation2 + $0xb0] sm:$0xff]  ;;  %v120_v22 = vld [vmem:[#allocation2 + $0xb8] sm:$0xff]  ;;  %p556_p9 = por %p555_p8, %p554_p7 }
  0x72   :  { %v378_v23 = vpack.c.bf16 %v102_v19, %v101_v18  ;;  %v380_v24 = vpack.c.bf16 %v120_v22, %v119_v21  ;;  %v103_v25 = vld [vmem:[#allocation2 + $0x30] sm:$0xff]  ;;  %v104_v26 = vld [vmem:[#allocation2 + $0x38] sm:$0xff]  ;;  %v121_v27 = vld [vmem:[#allocation2 + $0xc0] sm:$0xff] }
  0x73   :  { %v122_v28 = vld [vmem:[#allocation2 + $0xc8] sm:$0xff]  ;;  %v382_v29 = vpack.c.bf16 %v104_v26, %v103_v25  ;;  %v105_v31 = vld [vmem:[#allocation2 + $0x40] sm:$0xff]  ;;  %v123_v33 = vld [vmem:[#allocation2 + $0xd0] sm:$0xff]  ;;  %p557_p10 = pnand %p556_p9, %p550_p6 }
  0x74   :  { %v384_v30 = vpack.c.bf16 %v122_v28, %v121_v27  ;;  %v106_v32 = vld [vmem:[#allocation2 + $0x48] sm:$0xff]  ;;  %v124_v34 = vld [vmem:[#allocation2 + $0xd8] sm:$0xff]  ;;  %v107_v37 = vld [vmem:[#allocation2 + $0x50] sm:$0xff] }
  0x75   :  { %211 = vperm.xlu0 %412, %v208_v20   ;;  %v386_v35 = vpack.c.bf16 %v106_v32, %v105_v31  ;;  %v388_v36 = vpack.c.bf16 %v124_v34, %v123_v33  ;;  %v108_v38 = vld [vmem:[#allocation2 + $0x58] sm:$0xff]  ;;  %v125_v39 = vld [vmem:[#allocation2 + $0xe0] sm:$0xff]  ;;  %v126_v40 = vld [vmem:[#allocation2 + $0xe8] sm:$0xff] }
  0x76   :  { %v390_v41 = vpack.c.bf16 %v108_v38, %v107_v37  ;;  %v392_v42 = vpack.c.bf16 %v126_v40, %v125_v39  ;;  %v109_v43 = vld [vmem:[#allocation2 + $0x60] sm:$0xff]  ;;  %v110_v44 = vld [vmem:[#allocation2 + $0x68] sm:$0xff]  ;;  %v127_v45 = vld [vmem:[#allocation2 + $0xf0] sm:$0xff] }
  0x77   :  { %v128_v46 = vld [vmem:[#allocation2 + $0xf8] sm:$0xff]  ;;  %v394_v47 = vpack.c.bf16 %v110_v44, %v109_v43  ;;  %v111_v49 = vld [vmem:[#allocation2 + $0x70] sm:$0xff]  ;;  %v253_v40 = vld [vmem:[#allocation7] sm:$0x3] }
  0x78   :  { %375 = vmatpush3.bf16.xpose.msra.mxu0 %v374_v14  ;;  %v396_v48 = vpack.c.bf16 %v128_v46, %v127_v45  ;;  %v112_v50 = vld [vmem:[#allocation2 + $0x78] sm:$0xff]  ;;  %v209_v56 = vld [vmem:[#allocation10] sm:$0x3]  ;;  %v591_v14 = vmov 1966171168  }
  0x79   :  { %377 = vmatprep.subr.bf16.mxu0 %v376_v15  ;;  %v398_v51 = vpack.c.bf16 %v112_v50, %v111_v49  ;;  %v216_v58 = vrot.slane %v209_v56, %v215_v55  ;;  %v220_v59 = vrot.slane %v209_v56, %v219_v57  ;;  %v258_v15 = vunpack.c.l.s4 %v591_v14 }
  0x80   :  { %379 = vmatpush3.bf16.xpose.msra.mxu0 %v378_v23 }
  0x81   :  { %381 = vmatprep.subr.bf16.mxu0 %v380_v24  ;;  %v259_v24 = vunpack.c.0.s8 %v258_v15 }
  0x83   :  { %v262_v33 = vsub.s32 %v259_v24, %v214_v53 }
  0x88   :  { %383 = vmatpush3.bf16.xpose.msra.mxu0 %v382_v29 }
  0x89   :  { %385 = vmatprep.subr.bf16.mxu0 %v384_v30 }
  0x90   :  { %387 = vmatpush3.bf16.xpose.msra.mxu0 %v386_v35 }
  0x91   :  { %389 = vmatprep.subr.bf16.mxu0 %v388_v36 }
  0x98   :  { %391 = vmatpush3.bf16.xpose.msra.mxu0 %v390_v41 }
  0x99   :  { %393 = vmatprep.subr.bf16.mxu0 %v392_v42 }
  0xa0   :  { %395 = vmatpush3.bf16.xpose.msra.mxu0 %v394_v47 }
  0xa1   :  { %397 = vmatprep.subr.bf16.mxu0 %v396_v48 }
  0xa8   :  { %399 = vmatpush3.bf16.xpose.msra.mxu0 %v398_v51 }
  0xaf   :  { %367 = vmatmul.mubr.f32.vlgmr.msra.gmra.mrb[0].mxu0 %v96_v16 }
  0xf0   :  { %v204_v54 = vpop.permute.xlu0 %203 }
  0xf4   :  { %v212_v60 = vpop.permute.xlu0 %211 }
  0xf5   :  { %vm221_vm0 = vcmp.eq.s32.totalorder %v212_v60, %v216_v58  ;;  %vm222_vm1 = vcmp.eq.s32.totalorder %v212_v60, %v220_v59 }
  0xf6   :  { %v223_v1 = vsel %vm221_vm0, 1e+30, %v590_v0  ;;  %v224_v3 = vsel %vm222_vm1, 1e+30, %v590_v0 }
 0x182   :  { %v195_v61 = vpop.f32.mrb[0].mxu0 }
 0x183   :  { %v206_v62 = vadd.f32 %v204_v54, %v195_v61  ;;  %v197_v63 = vpop.f32.mrb[1].mxu0 }
 0x184   :  { %v207_v2 = vadd.f32 %v204_v54, %v197_v63 }
 0x185   :  { %v225_v4 = vmin.f32 %v206_v62, %v223_v1  ;;  %v239_v5 = vmax.f32 %v206_v62, %v223_v1 }
 0x186   :  { %v226_v6 = vmin.f32 %v207_v2, %v224_v3  ;;  %v240_v7 = vmax.f32 %v207_v2, %v224_v3 }
 0x187   :  { %v227_v8 = vrot.slane %v225_v4, 4  ;;  %v241_v9 = vrot.slane %v239_v5, 4 }
 0x188   :  { %v233_v10 = vrot.slane %v226_v6, 4  ;;  %v247_v11 = vrot.slane %v240_v7, 4 }
 0x189   :  { %v228_v12 = vmax.f32 %v225_v4, %v227_v8  ;;  %v242_v13 = vmin.f32 %v239_v5, %v241_v9 }
 0x18a   :  { %v234_v16 = vmax.f32 %v226_v6, %v233_v10  ;;  %v248_v17 = vmin.f32 %v240_v7, %v247_v11 }
 0x18b   :  { %v229_v18 = vrot.slane %v228_v12, 2  ;;  %v243_v19 = vrot.slane %v242_v13, 2 }
 0x18c   :  { %v235_v20 = vrot.slane %v234_v16, 2  ;;  %v249_v21 = vrot.slane %v248_v17, 2 }
 0x18d   :  { %v230_v22 = vmax.f32 %v228_v12, %v229_v18  ;;  %v244_v23 = vmin.f32 %v242_v13, %v243_v19 }
 0x18e   :  { %v236_v25 = vmax.f32 %v234_v16, %v235_v20  ;;  %v250_v26 = vmin.f32 %v248_v17, %v249_v21 }
 0x18f   :  { %v231_v27 = vrot.slane %v230_v22, 1  ;;  %v245_v28 = vrot.slane %v244_v23, 1 }
 0x190   :  { %v237_v29 = vrot.slane %v236_v25, 1  ;;  %v251_v30 = vrot.slane %v250_v26, 1 }
 0x191   :  { %v232_v31 = vmax.f32 %v230_v22, %v231_v27  ;;  %v246_v32 = vmin.f32 %v244_v23, %v245_v28 }
 0x192   :  { %v238_v34 = vmax.f32 %v236_v25, %v237_v29  ;;  %v252_v35 = vmin.f32 %v250_v26, %v251_v30 }
 0x194   :  { %v256_v36 = vcombine.low %v232_v31, %v238_v34  ;;  %v283_v37 = vcombine.low %v246_v32, %v252_v35 }
 0x196   :  { %v263_v38 = vrot.slane %v256_v36, %v262_v33  ;;  %v290_v39 = vrot.slane %v283_v37, %v262_v33 }
 0x198   :  { %v270_v41 = vrot.slane %v263_v38, %v262_v33  ;;  %v297_v42 = vrot.slane %v290_v39, %v262_v33 }
 0x19a   :  { %v272_v43 = vadd.f32 %v270_v41, %v253_v40  ;;  %v299_v44 = vadd.f32 %v297_v42, %v253_v40 }
 0x19c   :  { %v273_v45 = vmax.f32 %v272_v43, 1e-12  ;;  %v300_v46 = vmax.f32 %v299_v44, 1e-12 }
 0x19e   :  { %413 = vrsqrt.f32 %v273_v45  ;;  %vm276_vm2 = vcmp.eq.f32.partialorder %v273_v45, inf  ;;  %v279_v50 = vand.u32 2147483648, %v273_v45  ;;  %vm278_vm3 = vcmp.eq.f32.partialorder %v273_v45, 0.0 }
 0x19f   :  { %415 = vrsqrt.f32 %v300_v46  ;;  %vm303_vm4 = vcmp.eq.f32.partialorder %v300_v46, inf  ;;  %v306_v54 = vand.u32 2147483648, %v300_v46  ;;  %vm305_vm5 = vcmp.eq.f32.partialorder %v300_v46, 0.0 }
 0x1a8   :  { %v414_v47 = vpop.eup %413 }
 0x1a9   :  { %v416_v48 = vpop.eup %415  ;;  %v275_v49 = vmul.f32 %v414_v47, %v273_v45 }
 0x1aa   :  { %v302_v51 = vmul.f32 %v416_v48, %v300_v46 }
 0x1ab   :  { %v277_v53 = vsel %vm276_vm2, %v273_v45, %v275_v49 }
 0x1ac   :  { %v280_v55 = vsel %vm278_vm3, %v279_v50, %v277_v53  ;;  %v304_v56 = vsel %vm303_vm4, %v300_v46, %v302_v51 }
 0x1ad   :  { %v307_v57 = vsel %vm305_vm5, %v306_v54, %v304_v56 }
 0x1ae   :  { %v308_v58 = vsub.f32 %v280_v55, %v307_v57 }
 0x1b0   :  { %v309_v59 = vadd.f32 0.3, %v308_v58 }
 0x1b2   :  { %v310_v60 = vmax.f32 %v309_v59, 0.0 }
 0x1b4   :  { %315 = vst.msk [vmem:[#allocation13] sm:$0x3] %vm313_vm6, %v310_v60 }
 0x1b5   :  { %560 = shalt.err (!%p557_p10)
}
 0x1b6   :  { %s561_s0 = scalar_lea.hbm %s720_s6, 32 }
 0x1b7   :  { %p562_p11 = scmp.ne.s32.totalorder %s720_s6, %s561_s0  ;;  %p565_p12 = scmp.lt.u32.totalorder %s561_s0, %s720_s6 }
 0x1b9   :  { %p567_p13 = pnand %p565_p12, %p562_p11 }
 0x1bb   :  { %570 = shalt.err (!%p567_p13)
}
 0x1bc   :  { %325 = dma.vmem_to_hbm [thread:$0]  %s323_s16, 32, %s720_s6, [#allocation4]  }
 0x1bd   :  { %579 = dma.done.wait [#allocation4], 32  }
 0x1be   :  { %580 = vsyncadd [#allocation4], 4294967264 }
 0x1bf   :  { %329 = vsyncpa [#allocation3], 1 }
 0x1c0   :  { %330 = vsyncpa [#allocation6], 1 }
 0x1c1   :  { %331 = vsyncpa [#allocation9], 1 }
 0x1c2   :  { %332 = vsyncpa [#allocation12], 1 }
 0x1c3   :  { %333 = vsyncpa [#allocation4], 1 }

</bundles_post_ra>
